<compile_context>
chip_gen: v5e
topology: v5e:2x2
jax: 0.10.0
libtpu: 0.0.40
codegen_flags: <defaults>
</compile_context>

<pallas_src>
import jax
import jax.numpy as jnp
from jax.experimental import pallas as pl
from jax.experimental.pallas import tpu as pltpu

LANE = 128
SUBLANE = 8


def _round_up(n, m):
    return (n + m - 1) // m * m


# ---------------------------------------------------------------------------
# Shared MLP body (operates on VMEM-resident tiles inside the kernels).
# MXU operands use the weight dtype (f32 or bf16); accumulation, bias adds and
# tanh stay in f32.
# ---------------------------------------------------------------------------
def _mlp(x, t, w1x, w1t, b1, w2, b2, w3, b3):
    cdt = w1x.dtype
    h = jnp.dot(x.astype(cdt), w1x, preferred_element_type=jnp.float32)
    h = jnp.tanh(h + t * w1t + b1)
    h = jnp.dot(h.astype(cdt), w2, preferred_element_type=jnp.float32)
    h = jnp.tanh(h + b2)
    return jnp.dot(h.astype(cdt), w3, preferred_element_type=jnp.float32) + b3


# ---------------------------------------------------------------------------
# Kernels
# ---------------------------------------------------------------------------
def flownet_kernel(t_ref, x_ref, w1x_ref, w1t_ref, b1_ref,
                   w2_ref, b2_ref, w3_ref, b3_ref, o_ref):
    """Single ODEFunc.forward(t, x) evaluation for one batch tile."""
    t = t_ref[0]                                   # scalar prefetch (SMEM)
    out = _mlp(x_ref[...], t, w1x_ref[...], w1t_ref[...], b1_ref[...],
               w2_ref[...], b2_ref[...], w3_ref[...], b3_ref[...])
    o_ref[...] = out.astype(o_ref.dtype)


def euler_kernel(sch_ref, x_ref, w1x_ref, w1t_ref, b1_ref,
                 w2_ref, b2_ref, w3_ref, b3_ref, o_ref):
    """Fused fixed-step Euler integration: grid axis 1 = solver step.

    The output block is revisited across the step axis, so it acts as the
    VMEM-resident state carrier; weights are DMA'd once per batch tile.
    """
    s = pl.program_id(1)
    t0 = sch_ref[0]
    dt = sch_ref[1]
    t = t0 + dt * s.astype(jnp.float32)

    @pl.when(s == 0)
    def _():
        o_ref[...] = x_ref[...]

    xs = o_ref[...]
    v = _mlp(xs, t, w1x_ref[...], w1t_ref[...], b1_ref[...],
             w2_ref[...], b2_ref[...], w3_ref[...], b3_ref[...])
    o_ref[...] = xs + dt * v


# ---------------------------------------------------------------------------
# Parameters (PyTorch nn.Linear-like init) and lane-dense padding
# ---------------------------------------------------------------------------
def make_flow_params(key, dim, hidden):
    k1, k2, k3, k4, k5, k6 = jax.random.split(key, 6)
    s1 = 1.0 / jnp.sqrt(dim + 1.0)
    s2 = 1.0 / jnp.sqrt(float(hidden))
    w1 = jax.random.uniform(k1, (dim + 1, hidden), jnp.float32, -s1, s1)
    b1 = jax.random.uniform(k2, (1, hidden), jnp.float32, -s1, s1)
    w2 = jax.random.uniform(k3, (hidden, hidden), jnp.float32, -s2, s2)
    b2 = jax.random.uniform(k4, (1, hidden), jnp.float32, -s2, s2)
    w3 = jax.random.uniform(k5, (hidden, dim), jnp.float32, -s2, s2)
    b3 = jax.random.uniform(k6, (1, dim), jnp.float32, -s2, s2)
    return dict(w1x=w1[:dim], w1t=w1[dim:dim + 1], b1=b1,
                w2=w2, b2=b2, w3=w3, b3=b3)


def pad_params(params, dim, hidden, *, weight_dtype=jnp.float32):
    """Zero-pad D and H to multiples of 128 (lane-dense); exact math."""
    dp = _round_up(dim, LANE)
    hp = _round_up(hidden, LANE)

    def pad2(a, r, c, dtype):
        out = jnp.zeros((r, c), dtype)
        return out.at[:a.shape[0], :a.shape[1]].set(a.astype(dtype))

    return dict(
        w1x=pad2(params["w1x"], dp, hp, weight_dtype),
        w1t=pad2(params["w1t"], 1, hp, jnp.float32),
        b1=pad2(params["b1"], 1, hp, jnp.float32),
        w2=pad2(params["w2"], hp, hp, weight_dtype),
        b2=pad2(params["b2"], 1, hp, jnp.float32),
        w3=pad2(params["w3"], hp, dp, weight_dtype),
        b3=pad2(params["b3"], 1, dp, jnp.float32),
    )


def _weight_specs(padded, const_map):
    dp_in, hp = padded["w1x"].shape
    dp_out = padded["w3"].shape[1]
    return [
        pl.BlockSpec((dp_in, hp), const_map),   # w1x
        pl.BlockSpec((1, hp), const_map),       # w1t
        pl.BlockSpec((1, hp), const_map),       # b1
        pl.BlockSpec((hp, hp), const_map),      # w2
        pl.BlockSpec((1, hp), const_map),       # b2
        pl.BlockSpec((hp, dp_out), const_map),  # w3
        pl.BlockSpec((1, dp_out), const_map),   # b3
    ]


def _pad_x(x, bp, dp):
    b, d = x.shape
    return jnp.zeros((bp, dp), jnp.float32).at[:b, :d].set(x.astype(jnp.float32))


def _batch_tiling(b, batch_tile):
    tb = min(batch_tile, _round_up(b, SUBLANE))
    bp = _round_up(b, tb)
    return tb, bp


# ---------------------------------------------------------------------------
# Wrappers
# ---------------------------------------------------------------------------
def ode_func_forward(padded, t, x, *, batch_tile=256):
    """Pallas equivalent of ODEFunc.forward(t, x) (single evaluation)."""
    b, d = x.shape
    dp_in, hp = padded["w1x"].shape
    dp_out = padded["w3"].shape[1]
    tb, bp = _batch_tiling(b, batch_tile)
    xp = _pad_x(x, bp, dp_in)
    t_arr = jnp.asarray([t], dtype=jnp.float32)

    const = lambda i, t_ref: (0, 0)
    out = pl.pallas_call(
        flownet_kernel,
        out_shape=jax.ShapeDtypeStruct((bp, dp_out), jnp.float32),
        grid_spec=pltpu.PrefetchScalarGridSpec(
            num_scalar_prefetch=1,
            grid=(bp // tb,),
            in_specs=[pl.BlockSpec((tb, dp_in), lambda i, t_ref: (i, 0))]
                     + _weight_specs(padded, const),
            out_specs=pl.BlockSpec((tb, dp_out), lambda i, t_ref: (i, 0)),
        ),
        compiler_params=pltpu.CompilerParams(
            dimension_semantics=("parallel",)),
    )(t_arr, xp, padded["w1x"], padded["w1t"], padded["b1"],
      padded["w2"], padded["b2"], padded["w3"], padded["b3"])
    return out[:b, :d]


def ode_integrate_euler(padded, x0, t0, t1, num_steps, *, batch_tile=256):
    """num_steps Euler steps of dx/dt = flow_net(x, t) fused in ONE pallas_call."""
    b, d = x0.shape
    dp_in, hp = padded["w1x"].shape
    dp_out = padded["w3"].shape[1]
    assert dp_in == dp_out, "flow net must map D -> D for ODE integration"
    tb, bp = _batch_tiling(b, batch_tile)
    xp = _pad_x(x0, bp, dp_in)
    dt = (t1 - t0) / num_steps
    sched = jnp.asarray([t0, dt], dtype=jnp.float32)

    const = lambda i, s, sch: (0, 0)
    out = pl.pallas_call(
        euler_kernel,
        out_shape=jax.ShapeDtypeStruct((bp, dp_out), jnp.float32),
        grid_spec=pltpu.PrefetchScalarGridSpec(
            num_scalar_prefetch=1,
            grid=(bp // tb, num_steps),
            in_specs=[pl.BlockSpec((tb, dp_in), lambda i, s, sch: (i, 0))]
                     + _weight_specs(padded, const),
            out_specs=pl.BlockSpec((tb, dp_out), lambda i, s, sch: (i, 0)),
        ),
        compiler_params=pltpu.CompilerParams(
            dimension_semantics=("parallel", "arbitrary")),
    )(sched, xp, padded["w1x"], padded["w1t"], padded["b1"],
      padded["w2"], padded["b2"], padded["w3"], padded["b3"])
    return out[:b, :d]


# ---------------------------------------------------------------------------
# Pure-JAX references (mirror the PyTorch forward exactly)
# ---------------------------------------------------------------------------
def ode_func_reference(params, t, x):
    b = x.shape[0]
    t_tensor = jnp.full((b, 1), t, dtype=jnp.float32)
    w1 = jnp.concatenate([params["w1x"], params["w1t"]], axis=0)
    h = jnp.concatenate([x, t_tensor], axis=-1)
    h = jnp.tanh(h @ w1 + params["b1"])
    h = jnp.tanh(h @ params["w2"] + params["b2"])
    return h @ params["w3"] + params["b3"]


def euler_reference(params, x0, t0, t1, num_steps):
    dt = (t1 - t0) / num_steps
    x = x0.astype(jnp.float32)
    for s in range(num_steps):
        x = x + dt * ode_func_reference(params, t0 + dt * s, x)
    return x


if __name__ == "__main__":
    B, D, H = 8, 16, 32
    key = jax.random.PRNGKey(0)
    kp, kx = jax.random.split(key)

    params = make_flow_params(kp, D, H)
    x = jax.random.normal(kx, (B, D), dtype=jnp.float32)
    t = 0.3

    # --- single forward, f32 weights (lane-dense padded) --------------------
    pf32 = pad_params(params, D, H, weight_dtype=jnp.float32)
    out = jax.block_until_ready(ode_func_forward(pf32, t, x))
    ref = ode_func_reference(params, t, x)
    assert out.shape == (B, D)
    assert jnp.allclose(out, ref, atol=1e-5, rtol=1e-5), "f32 forward mismatch"

    # --- single forward, bf16 MXU operands (v6e/v7x path) -------------------
    pbf16 = pad_params(params, D, H, weight_dtype=jnp.bfloat16)
    out_bf = jax.block_until_ready(ode_func_forward(pbf16, t, x))
    assert jnp.allclose(out_bf, ref, atol=5e-2, rtol=5e-2), "bf16 forward mismatch"

    # --- fused multi-step Euler integration in one kernel launch ------------
    n_steps = 4
    xT = jax.block_until_ready(ode_integrate_euler(pf32, x, 0.0, 1.0, n_steps))
    xT_ref = euler_reference(params, x, 0.0, 1.0, n_steps)
    assert xT.shape == (B, D)
    assert jnp.allclose(xT, xT_ref, atol=1e-4, rtol=1e-4), "euler mismatch"

    print("KERNEL_OK")
</pallas_src>

<mosaic_0001>
module attributes {stable_mosaic.version = 11 : i64} {
  func.func @flownet_kernel(%arg0: i32, %arg1: memref<1xf32, #tpu.memory_space<smem>>, %arg2: memref<8x128xf32, #tpu.memory_space<vmem>>, %arg3: memref<128x128xf32, #tpu.memory_space<vmem>>, %arg4: memref<1x128xf32, #tpu.memory_space<vmem>>, %arg5: memref<1x128xf32, #tpu.memory_space<vmem>>, %arg6: memref<128x128xf32, #tpu.memory_space<vmem>>, %arg7: memref<1x128xf32, #tpu.memory_space<vmem>>, %arg8: memref<128x128xf32, #tpu.memory_space<vmem>>, %arg9: memref<1x128xf32, #tpu.memory_space<vmem>>, %arg10: memref<8x128xf32, #tpu.memory_space<vmem>>) attributes {dimension_semantics = [#tpu.dimension_semantics<parallel>], iteration_bounds = array<i64: 1>, scalar_prefetch = 1 : i64, scratch_operands = 0 : i64, tpu.core_type = #tpu.core_type<tc>, window_params = [{transform_indices = @transform_0, window_bounds = array<i64: 8, 128>}, {pipeline_mode = #tpu.pipeline_mode<synchronous>, transform_indices = @transform_1, window_bounds = array<i64: 128, 128>}, {pipeline_mode = #tpu.pipeline_mode<synchronous>, transform_indices = @transform_2, window_bounds = array<i64: 1, 128>}, {pipeline_mode = #tpu.pipeline_mode<synchronous>, transform_indices = @transform_3, window_bounds = array<i64: 1, 128>}, {pipeline_mode = #tpu.pipeline_mode<synchronous>, transform_indices = @transform_4, window_bounds = array<i64: 128, 128>}, {pipeline_mode = #tpu.pipeline_mode<synchronous>, transform_indices = @transform_5, window_bounds = array<i64: 1, 128>}, {pipeline_mode = #tpu.pipeline_mode<synchronous>, transform_indices = @transform_6, window_bounds = array<i64: 128, 128>}, {pipeline_mode = #tpu.pipeline_mode<synchronous>, transform_indices = @transform_7, window_bounds = array<i64: 1, 128>}, {transform_indices = @transform_8, window_bounds = array<i64: 8, 128>}]} {
    %c0 = arith.constant 0 : index
    %0 = memref.load %arg1[%c0] : memref<1xf32, #tpu.memory_space<smem>>
    %c0_0 = arith.constant 0 : index
    %c0_1 = arith.constant 0 : index
    %1 = vector.load %arg2[%c0_0, %c0_1] : memref<8x128xf32, #tpu.memory_space<vmem>>, vector<8x128xf32>
    %c0_2 = arith.constant 0 : index
    %c0_3 = arith.constant 0 : index
    %2 = vector.load %arg3[%c0_2, %c0_3] : memref<128x128xf32, #tpu.memory_space<vmem>>, vector<128x128xf32>
    %c0_4 = arith.constant 0 : index
    %c0_5 = arith.constant 0 : index
    %3 = vector.load %arg4[%c0_4, %c0_5] : memref<1x128xf32, #tpu.memory_space<vmem>>, vector<1x128xf32>
    %c0_6 = arith.constant 0 : index
    %c0_7 = arith.constant 0 : index
    %4 = vector.load %arg5[%c0_6, %c0_7] : memref<1x128xf32, #tpu.memory_space<vmem>>, vector<1x128xf32>
    %c0_8 = arith.constant 0 : index
    %c0_9 = arith.constant 0 : index
    %5 = vector.load %arg6[%c0_8, %c0_9] : memref<128x128xf32, #tpu.memory_space<vmem>>, vector<128x128xf32>
    %c0_10 = arith.constant 0 : index
    %c0_11 = arith.constant 0 : index
    %6 = vector.load %arg7[%c0_10, %c0_11] : memref<1x128xf32, #tpu.memory_space<vmem>>, vector<1x128xf32>
    %c0_12 = arith.constant 0 : index
    %c0_13 = arith.constant 0 : index
    %7 = vector.load %arg8[%c0_12, %c0_13] : memref<128x128xf32, #tpu.memory_space<vmem>>, vector<128x128xf32>
    %c0_14 = arith.constant 0 : index
    %c0_15 = arith.constant 0 : index
    %8 = vector.load %arg9[%c0_14, %c0_15] : memref<1x128xf32, #tpu.memory_space<vmem>>, vector<1x128xf32>
    %cst = arith.constant dense<0.000000e+00> : vector<8x128xf32>
    %9 = tpu.matmul %1, %2, %cst {dimension_numbers = #tpu.dot_dimension_numbers<[1], [0], [0], [1], [0, 0, 1, 1], [], []>} : vector<8x128xf32>, vector<128x128xf32>, vector<8x128xf32> -> vector<8x128xf32>
    %10 = vector.broadcast %0 : f32 to vector<1x128xf32>
    %11 = arith.mulf %10, %3 : vector<1x128xf32>
    %12 = vector.broadcast %11 : vector<1x128xf32> to vector<8x128xf32>
    %13 = arith.addf %9, %12 : vector<8x128xf32>
    %14 = vector.broadcast %4 : vector<1x128xf32> to vector<8x128xf32>
    %15 = arith.addf %13, %14 : vector<8x128xf32>
    %16 = math.tanh %15 : vector<8x128xf32>
    %cst_16 = arith.constant dense<0.000000e+00> : vector<8x128xf32>
    %17 = tpu.matmul %16, %5, %cst_16 {dimension_numbers = #tpu.dot_dimension_numbers<[1], [0], [0], [1], [0, 0, 1, 1], [], []>} : vector<8x128xf32>, vector<128x128xf32>, vector<8x128xf32> -> vector<8x128xf32>
    %18 = vector.broadcast %6 : vector<1x128xf32> to vector<8x128xf32>
    %19 = arith.addf %17, %18 : vector<8x128xf32>
    %20 = math.tanh %19 : vector<8x128xf32>
    %cst_17 = arith.constant dense<0.000000e+00> : vector<8x128xf32>
    %21 = tpu.matmul %20, %7, %cst_17 {dimension_numbers = #tpu.dot_dimension_numbers<[1], [0], [0], [1], [0, 0, 1, 1], [], []>} : vector<8x128xf32>, vector<128x128xf32>, vector<8x128xf32> -> vector<8x128xf32>
    %22 = vector.broadcast %8 : vector<1x128xf32> to vector<8x128xf32>
    %23 = arith.addf %21, %22 : vector<8x128xf32>
    %c0_18 = arith.constant 0 : index
    %c0_19 = arith.constant 0 : index
    %24 = vector.load %arg10[%c0_18, %c0_19] : memref<8x128xf32, #tpu.memory_space<vmem>>, vector<8x128xf32>
    tpu.vector_store %arg10[%c0_18, %c0_19], %23 {strides = array<i32>} : memref<8x128xf32, #tpu.memory_space<vmem>>, vector<8x128xf32>,
    return
  }
  func.func @transform_0(%arg0: i32, %arg1: memref<1xf32, #tpu.memory_space<smem>>) -> (i32, i32) {
    %c0_i32 = arith.constant 0 : i32
    %c0_i32_0 = arith.constant 0 : i32
    return %arg0, %c0_i32 : i32, i32
  }
  func.func @transform_1(%arg0: i32, %arg1: memref<1xf32, #tpu.memory_space<smem>>) -> (i32, i32) {
    %c0_i32 = arith.constant 0 : i32
    %c0_i32_0 = arith.constant 0 : i32
    %c0_i32_1 = arith.constant 0 : i32
    return %c0_i32, %c0_i32_0 : i32, i32
  }
  func.func @transform_2(%arg0: i32, %arg1: memref<1xf32, #tpu.memory_space<smem>>) -> (i32, i32) {
    %c0_i32 = arith.constant 0 : i32
    %c0_i32_0 = arith.constant 0 : i32
    %c0_i32_1 = arith.constant 0 : i32
    return %c0_i32, %c0_i32_0 : i32, i32
  }
  func.func @transform_3(%arg0: i32, %arg1: memref<1xf32, #tpu.memory_space<smem>>) -> (i32, i32) {
    %c0_i32 = arith.constant 0 : i32
    %c0_i32_0 = arith.constant 0 : i32
    %c0_i32_1 = arith.constant 0 : i32
    return %c0_i32, %c0_i32_0 : i32, i32
  }
  func.func @transform_4(%arg0: i32, %arg1: memref<1xf32, #tpu.memory_space<smem>>) -> (i32, i32) {
    %c0_i32 = arith.constant 0 : i32
    %c0_i32_0 = arith.constant 0 : i32
    %c0_i32_1 = arith.constant 0 : i32
    return %c0_i32, %c0_i32_0 : i32, i32
  }
  func.func @transform_5(%arg0: i32, %arg1: memref<1xf32, #tpu.memory_space<smem>>) -> (i32, i32) {
    %c0_i32 = arith.constant 0 : i32
    %c0_i32_0 = arith.constant 0 : i32
    %c0_i32_1 = arith.constant 0 : i32
    return %c0_i32, %c0_i32_0 : i32, i32
  }
  func.func @transform_6(%arg0: i32, %arg1: memref<1xf32, #tpu.memory_space<smem>>) -> (i32, i32) {
    %c0_i32 = arith.constant 0 : i32
    %c0_i32_0 = arith.constant 0 : i32
    %c0_i32_1 = arith.constant 0 : i32
    return %c0_i32, %c0_i32_0 : i32, i32
  }
  func.func @transform_7(%arg0: i32, %arg1: memref<1xf32, #tpu.memory_space<smem>>) -> (i32, i32) {
    %c0_i32 = arith.constant 0 : i32
    %c0_i32_0 = arith.constant 0 : i32
    %c0_i32_1 = arith.constant 0 : i32
    return %c0_i32, %c0_i32_0 : i32, i32
  }
  func.func @transform_8(%arg0: i32, %arg1: memref<1xf32, #tpu.memory_space<smem>>) -> (i32, i32) {
    %c0_i32 = arith.constant 0 : i32
    %c0_i32_0 = arith.constant 0 : i32
    return %arg0, %c0_i32 : i32, i32
  }
}

</mosaic_0001>

<bundles_post_ra>
// kernel: tpu_custom_call.1
= control target key start
LH: loop header
LB: loop body
LE: loop exit
PB: predicated region body
PF: predicated region fallthrough
CT: control target
= control target key end

     0   :  { %15 = vsyncpa [#allocation5], 0  ;;  %s473_s0 = inlined_call_operand.<no memory space> [shape: f32[1], index: 0, kind: input, shape index: {}]   ;;  %s474_s1 = inlined_call_operand.hbm [shape: f32[8,128], index: 1, kind: input, shape index: {}]   ;;  %s475_s2 = inlined_call_operand.hbm [shape: f32[128,128], index: 2, kind: input, shape index: {}]   ;;  %s476_s3 = inlined_call_operand.vmem [shape: f32[1,128], index: 3, kind: input, shape index: {}]   ;;  %s477_s4 = inlined_call_operand.vmem [shape: f32[1,128], index: 4, kind: input, shape index: {}]   ;;  %s478_s5 = inlined_call_operand.hbm [shape: f32[128,128], index: 5, kind: input, shape index: {}]   ;;  %s479_s6 = inlined_call_operand.vmem [shape: f32[1,128], index: 6, kind: input, shape index: {}]   ;;  %s480_s7 = inlined_call_operand.hbm [shape: f32[128,128], index: 7, kind: input, shape index: {}]   ;;  %s481_s8 = inlined_call_operand.vmem [shape: f32[1,128], index: 8, kind: input, shape index: {}]   ;;  %s482_s9 = inlined_call_operand.hbm [shape: f32[8,128], index: 9, kind: output, shape index: {}]  }
   0x1   :  { %16 = vsyncpa [#allocation8], 0 }
   0x2   :  { %17 = vsyncpa [#allocation11], 0  ;;  %s34_s11 = sshll.u32 %s475_s2, 4  ;;  %s35_s11 = int_to_ptr.hbm [resolvable:$true] %s34_s11 }
   0x3   :  { %18 = vsyncpa [#allocation6], 0  ;;  %s386_s12 = smov [#allocation7]   ;;  %s24_s16 = sshll.u32 %s474_s1, 4  ;;  %s25_s16 = int_to_ptr.hbm [resolvable:$true] %s24_s16 }
   0x4   :  { %s36_s13 = sshll.u32 %s386_s12, 4  ;;  %s387_s17 = smov 128   ;;  %s37_s13 = int_to_ptr.vmem [resolvable:$true] %s36_s13 }
   0x5   :  { %s388_s18 = smov 8   ;;  %s389_s19 = smov [#allocation4]  }
   0x6   :  { %42 = dma.hbm_to_vmem [thread:$0]  %s35_s11, 2048, %s37_s13, [#allocation8], %s387_s17, %s387_s17, %s388_s18  }
   0x7   :  { %s26_s20 = sshll.u32 %s389_s19, 4  ;;  %s51_s23 = sshll.u32 %s478_s5, 4  ;;  %s27_s20 = int_to_ptr.vmem [resolvable:$true] %s26_s20  ;;  %s52_s23 = int_to_ptr.hbm [resolvable:$true] %s51_s23 }
   0x8   :  { %29 = dma.hbm_to_vmem [thread:$0]  %s25_s16, 128, %s27_s20, [#allocation5]  }
   0x9   :  { %s66_s25 = sshll.u32 %s480_s7, 4  ;;  %s390_s26 = smov [#allocation9]   ;;  %s67_s25 = int_to_ptr.hbm [resolvable:$true] %s66_s25 }
   0xa   :  { %s53_s27 = sshll.u32 %s390_s26, 4  ;;  %s391_s1 = smov [#allocation10]   ;;  %s54_s27 = int_to_ptr.vmem [resolvable:$true] %s53_s27 }
   0xb   :  { %59 = dma.hbm_to_vmem [thread:$0]  %s52_s23, 2048, %s54_s27, [#allocation8], %s387_s17, %s387_s17, %s388_s18  }
   0xc   :  { %s68_s28 = sshll.u32 %s391_s1, 4  ;;  %s69_s28 = int_to_ptr.vmem [resolvable:$true] %s68_s28 }
   0xd   :  { %74 = dma.hbm_to_vmem [thread:$0]  %s67_s25, 2048, %s69_s28, [#allocation11], %s387_s17, %s387_s17, %s388_s18  }
   0xe   :  { %378 = dma.done.wait [#allocation5], 128  }
   0xf   :  { %379 = vsyncadd [#allocation5], 4294967168 }
  0x10   :  { %380 = dma.done.wait [#allocation8], 4096  }
  0x11   :  { %381 = vsyncadd [#allocation8], 4294963200 }
  0x12   :  { %382 = dma.done.wait [#allocation11], 2048  }
  0x13   :  { %383 = vsyncadd [#allocation11], 4294965248  ;;  %v110_v0 = vld [vmem:[#allocation7 + $0x78] sm:$0xff]  ;;  %v109_v1 = vld [vmem:[#allocation7 + $0x70] sm:$0xff]  ;;  %v147_v40 = vstv %s473_s0  ;;  %s392_s13 = smov [#allocation12]   ;;  %s232_s17 = sshll.u32 %s482_s9, 4  ;;  %s233_s17 = int_to_ptr.hbm [resolvable:$true] %s232_s17 }
  0x14   :  { %152 = vmatpush.msra.mxu0 %v110_v0  ;;  %v108_v2 = vld [vmem:[#allocation7 + $0x68] sm:$0xff]  ;;  %v107_v3 = vld [vmem:[#allocation7 + $0x60] sm:$0xff]  ;;  %v128_v4 = vld [vmem:[#allocation9 + $0x78] sm:$0xff]  ;;  %s230_s14 = sshll.u32 %s392_s13, 4  ;;  %s231_s14 = int_to_ptr.vmem [resolvable:$true] %s230_s14 }
  0x15   :  { %v106_v5 = vld [vmem:[#allocation7 + $0x58] sm:$0xff]  ;;  %180 = vmatpush.msra.mxu1 %v128_v4  ;;  %v127_v6 = vld [vmem:[#allocation9 + $0x70] sm:$0xff]  ;;  %v126_v7 = vld [vmem:[#allocation9 + $0x68] sm:$0xff] }
  0x16   :  { %153 = vmatpush.msra.mxu0 %v109_v1  ;;  %v105_v8 = vld [vmem:[#allocation7 + $0x50] sm:$0xff]  ;;  %v125_v9 = vld [vmem:[#allocation9 + $0x60] sm:$0xff]  ;;  %v104_v10 = vld [vmem:[#allocation7 + $0x48] sm:$0xff] }
  0x17   :  { %181 = vmatpush.msra.mxu1 %v127_v6  ;;  %v124_v11 = vld [vmem:[#allocation9 + $0x58] sm:$0xff]  ;;  %v103_v12 = vld [vmem:[#allocation7 + $0x40] sm:$0xff]  ;;  %v123_v13 = vld [vmem:[#allocation9 + $0x50] sm:$0xff] }
  0x18   :  { %154 = vmatpush.msra.mxu0 %v108_v2  ;;  %v102_v14 = vld [vmem:[#allocation7 + $0x38] sm:$0xff]  ;;  %v122_v15 = vld [vmem:[#allocation9 + $0x48] sm:$0xff]  ;;  %v101_v16 = vld [vmem:[#allocation7 + $0x30] sm:$0xff] }
  0x19   :  { %182 = vmatpush.msra.mxu1 %v126_v7  ;;  %v121_v17 = vld [vmem:[#allocation9 + $0x40] sm:$0xff]  ;;  %v100_v18 = vld [vmem:[#allocation7 + $0x28] sm:$0xff]  ;;  %v120_v19 = vld [vmem:[#allocation9 + $0x38] sm:$0xff] }
  0x1a   :  { %155 = vmatpush.msra.mxu0 %v107_v3  ;;  %v99_v20 = vld [vmem:[#allocation7 + $0x20] sm:$0xff]  ;;  %v119_v21 = vld [vmem:[#allocation9 + $0x30] sm:$0xff]  ;;  %v98_v22 = vld [vmem:[#allocation7 + $0x18] sm:$0xff] }
  0x1b   :  { %183 = vmatpush.msra.mxu1 %v125_v9  ;;  %v97_v23 = vld [vmem:[#allocation7 + $0x10] sm:$0xff]  ;;  %v96_v24 = vld [vmem:[#allocation7 + $0x8] sm:$0xff]  ;;  %v95_v25 = vld [vmem:[#allocation7] sm:$0xff] }
  0x1c   :  { %156 = vmatpush.msra.mxu0 %v106_v5  ;;  %v94_v26 = vld [vmem:[#allocation4] sm:$0xff]  ;;  %v118_v27 = vld [vmem:[#allocation9 + $0x28] sm:$0xff]  ;;  %v117_v28 = vld [vmem:[#allocation9 + $0x20] sm:$0xff] }
  0x1d   :  { %184 = vmatpush.msra.mxu1 %v124_v11  ;;  %v116_v29 = vld [vmem:[#allocation9 + $0x18] sm:$0xff]  ;;  %v115_v30 = vld [vmem:[#allocation9 + $0x10] sm:$0xff]  ;;  %v114_v31 = vld [vmem:[#allocation9 + $0x8] sm:$0xff] }
  0x1e   :  { %157 = vmatpush.msra.mxu0 %v105_v8  ;;  %v113_v32 = vld [vmem:[#allocation9] sm:$0xff]  ;;  %v145_v33 = vld [vmem:[#allocation10 + $0x78] sm:$0xff]  ;;  %v144_v34 = vld [vmem:[#allocation10 + $0x70] sm:$0xff] }
  0x1f   :  { %185 = vmatpush.msra.mxu1 %v123_v13  ;;  %204 = vmatpush.msra.mxu2 %v145_v33  ;;  %v143_v35 = vld [vmem:[#allocation10 + $0x68] sm:$0xff]  ;;  %v142_v36 = vld [vmem:[#allocation10 + $0x60] sm:$0xff]  ;;  %v141_v37 = vld [vmem:[#allocation10 + $0x58] sm:$0xff] }
  0x20   :  { %158 = vmatpush.msra.mxu0 %v104_v10  ;;  %v140_v38 = vld [vmem:[#allocation10 + $0x50] sm:$0xff]  ;;  %v111_v39 = vld [vmem:[%s476_s3] sm:$0x1]  ;;  %v139_v41 = vld [vmem:[#allocation10 + $0x48] sm:$0xff] }
  0x21   :  { %186 = vmatpush.msra.mxu1 %v122_v15  ;;  %205 = vmatpush.msra.mxu2 %v144_v34  ;;  %v138_v42 = vld [vmem:[#allocation10 + $0x40] sm:$0xff]  ;;  %v148_v43 = vmul.f32 %v147_v40, %v111_v39  ;;  %v137_v44 = vld [vmem:[#allocation10 + $0x38] sm:$0xff]  ;;  %v136_v45 = vld [vmem:[#allocation10 + $0x30] sm:$0xff] }
  0x22   :  { %159 = vmatpush.msra.mxu0 %v103_v12  ;;  %v135_v47 = vld [vmem:[#allocation10 + $0x28] sm:$0xff]  ;;  %v251_v48 = vld [vmem:[%s477_s4] ss:$0 sm:$0xff]  ;;  %v134_v53 = vld [vmem:[#allocation10 + $0x20] sm:$0xff] }
  0x23   :  { %187 = vmatpush.msra.mxu1 %v121_v17  ;;  %206 = vmatpush.msra.mxu2 %v143_v35  ;;  %v150_v46 = vperm.slane %v148_v43, 0  ;;  %v133_v54 = vld [vmem:[#allocation10 + $0x18] sm:$0xff]  ;;  %v132_v55 = vld [vmem:[#allocation10 + $0x10] sm:$0xff]  ;;  %v131_v56 = vld [vmem:[#allocation10 + $0x8] sm:$0xff] }
  0x24   :  { %160 = vmatpush.msra.mxu0 %v102_v14  ;;  %v130_v57 = vld [vmem:[#allocation10] sm:$0xff]  ;;  %v252_v58 = vld [vmem:[%s479_s6] ss:$0 sm:$0xff] }
  0x25   :  { %188 = vmatpush.msra.mxu1 %v120_v19  ;;  %207 = vmatpush.msra.mxu2 %v142_v36  ;;  %v253_v62 = vld [vmem:[%s481_s8] ss:$0 sm:$0xff] }
  0x26   :  { %161 = vmatpush.msra.mxu0 %v101_v16 }
  0x27   :  { %189 = vmatpush.msra.mxu1 %v119_v21  ;;  %208 = vmatpush.msra.mxu2 %v141_v37 }
  0x28   :  { %162 = vmatpush.msra.mxu0 %v100_v18 }
  0x29   :  { %190 = vmatpush.msra.mxu1 %v118_v27  ;;  %209 = vmatpush.msra.mxu2 %v140_v38 }
  0x2a   :  { %163 = vmatpush.msra.mxu0 %v99_v20 }
  0x2b   :  { %191 = vmatpush.msra.mxu1 %v117_v28  ;;  %210 = vmatpush.msra.mxu2 %v139_v41 }
  0x2c   :  { %164 = vmatpush.msra.mxu0 %v98_v22 }
  0x2d   :  { %192 = vmatpush.msra.mxu1 %v116_v29  ;;  %211 = vmatpush.msra.mxu2 %v138_v42 }
  0x2e   :  { %165 = vmatpush.msra.mxu0 %v97_v23 }
  0x2f   :  { %193 = vmatpush.msra.mxu1 %v115_v30  ;;  %212 = vmatpush.msra.mxu2 %v137_v44 }
  0x30   :  { %166 = vmatpush.msra.mxu0 %v96_v24 }
  0x31   :  { %194 = vmatpush.msra.mxu1 %v114_v31  ;;  %213 = vmatpush.msra.mxu2 %v136_v45 }
  0x32   :  { %167 = vmatpush.msra.mxu0 %v95_v25 }
  0x33   :  { %168 = vmatmul.f32.vlgmr.msra.gmra.mxu0 %v94_v26  ;;  %195 = vmatpush.msra.mxu1 %v113_v32 }
  0x34   :  { %214 = vmatpush.msra.mxu2 %v135_v47 }
  0x36   :  { %215 = vmatpush.msra.mxu2 %v134_v53 }
  0x38   :  { %216 = vmatpush.msra.mxu2 %v133_v54 }
  0x3a   :  { %217 = vmatpush.msra.mxu2 %v132_v55 }
  0x3c   :  { %218 = vmatpush.msra.mxu2 %v131_v56 }
  0x3e   :  { %219 = vmatpush.msra.mxu2 %v130_v57 }
  0xb0   :  { %v169_v49 = vpop.f32.mrf.mxu0 }
  0xb1   :  { %v170_v50 = vadd.f32 %v169_v49, %v150_v46 }
  0xb3   :  { %v175_v51 = vadd.f32 %v251_v48, %v170_v50 }
  0xb5   :  { %254 = vtanh.f32 %v175_v51 }
  0xbb   :  { %v255_v52 = vpop.eup %254 }
  0xbc   :  { %196 = vmatmul.f32.vlgmr.msra.gmra.mxu1 %v255_v52 }
 0x139   :  { %v197_v59 = vpop.f32.mrf.mxu1 }
 0x13a   :  { %v198_v60 = vadd.f32 %v252_v58, %v197_v59 }
 0x13c   :  { %256 = vtanh.f32 %v198_v60 }
 0x142   :  { %v257_v61 = vpop.eup %256 }
 0x143   :  { %220 = vmatmul.f32.vlgmr.msra.gmra.mxu2 %v257_v61 }
 0x1c6   :  { %v221_v63 = vpop.f32.mrf.mxu2 }
 0x1c7   :  { %v222_v0 = vadd.f32 %v253_v62, %v221_v63 }
 0x1c9   :  { %224 = vst [vmem:[#allocation12] sm:$0xff] %v222_v0 }
 0x1ca   :  { %235 = dma.vmem_to_hbm [thread:$0]  %s231_s14, 128, %s233_s17, [#allocation6]  }
 0x1cb   :  { %384 = dma.done.wait [#allocation6], 128  }
 0x1cc   :  { %385 = vsyncadd [#allocation6], 4294967168 }
 0x1cd   :  { %240 = vsyncpa [#allocation5], 1 }
 0x1ce   :  { %241 = vsyncpa [#allocation8], 1 }
 0x1cf   :  { %242 = vsyncpa [#allocation11], 1 }
 0x1d0   :  { %243 = vsyncpa [#allocation6], 1 }

</bundles_post_ra>
